<compile_context>
chip_gen: v7x
topology: tpu7x:2x2x1
jax: 0.10.0
libtpu: 0.0.40
codegen_flags: <defaults>
</compile_context>

<pallas_src>
import jax
import jax.numpy as jnp
from jax.experimental import pallas as pl
from jax.experimental.pallas import tpu as pltpu


IN_DIM = 6       # 4 (state) + 2 (action)
K_AUG = 8        # 6 features + 1 ones-row (bias) + 1 zero pad -> sublane aligned
HIDDEN = 128
OUT_DIM = 1

MAX_TB = 8192    # (128, 8192) f32 hidden ~= 4 MiB; safe on v7x's 64 MiB VMEM
MIN_TB = 512     # lane-dense multiple of 128


def qcritic_kernel(xut_ref, w1_ref, w2_ref, b2_ref, out_ref):
    # xut_ref: (8, TB)    f32   rows 0-5 = [x;u]^T, row 6 = 1.0, row 7 = 0.0
    # w1_ref : (128, 8)   f32   cols 0-5 = W1, col 6 = b1, col 7 = 0.0
    # w2_ref : (1, 128)   f32   == W2
    # b2_ref : (1, 1)     f32   in SMEM
    # out_ref: (1, TB)    f32   lane-dense row of Q values

    # layer 1 (bias folded into the matmul): h = relu(W1_aug @ xut_aug)  -- MXU
    h = jnp.dot(w1_ref[...], xut_ref[...],
                preferred_element_type=jnp.float32)            # (128, TB)
    h = jnp.maximum(h, 0.0)                                    # only VALU work left

    # layer 2 (value head) also on the MXU: (1,128) @ (128,TB) -> (1,TB)
    v = jnp.dot(w2_ref[...], h, preferred_element_type=jnp.float32)
    out_ref[...] = v + b2_ref[0, 0]


def _pick_tb(batch):
    """Batch tile: scale with B, aim for >= 2 'parallel' grid steps (v7x
    megacore), round to a lane-friendly multiple of 512, cap for VMEM."""
    target = -(-batch // 2)                        # ceil(B / 2)
    tb = ((target + MIN_TB - 1) // MIN_TB) * MIN_TB
    return max(MIN_TB, min(MAX_TB, tb))


def qcritic_forward(x, u, w1, b1, w2, b2, *, tb=None):
    """x: (B, 4), u: (B, 2); w1: (128, 6), b1: (128,), w2: (1, 128), b2: (1, 1)."""
    B = x.shape[0]
    if tb is None:
        tb = _pick_tb(B)
    n_blocks = pl.cdiv(B, tb)
    b_pad = n_blocks * tb

    # Wrapper-side layout plumbing (done once):
    #   concat -> append ones (bias) + zero pad to K=8 -> pad batch -> transpose.
    # Single elementwise/copy pipeline over a (B, 8) array; no casts.
    ones = jnp.ones((B, 1), x.dtype)
    zeros = jnp.zeros((B, 1), x.dtype)
    xu_aug = jnp.concatenate([x, u, ones, zeros], axis=-1)          # (B, 8)
    xu_aug = jnp.pad(xu_aug, ((0, b_pad - B), (0, 0)))              # (b_pad, 8)
    xut_aug = xu_aug.T                                              # (8, b_pad)

    # Fold b1 into W1 as an extra column; pad K to 8.
    w1_aug = jnp.concatenate(
        [w1, b1.reshape(HIDDEN, 1), jnp.zeros((HIDDEN, 1), w1.dtype)],
        axis=-1)                                                    # (128, 8)
    w2_row = w2.reshape(OUT_DIM, HIDDEN)                            # (1, 128)
    b2_smem = b2.reshape(1, 1)

    out = pl.pallas_call(
        qcritic_kernel,
        out_shape=jax.ShapeDtypeStruct((1, b_pad), jnp.float32),
        grid=(n_blocks,),
        in_specs=[
            pl.BlockSpec((K_AUG, tb), lambda i: (0, i)),            # batch-blocked input
            pl.BlockSpec((HIDDEN, K_AUG), lambda i: (0, 0)),        # resident weights
            pl.BlockSpec((OUT_DIM, HIDDEN), lambda i: (0, 0)),
            pl.BlockSpec(memory_space=pltpu.MemorySpace.SMEM),      # scalar bias b2
        ],
        out_specs=pl.BlockSpec((1, tb), lambda i: (0, i)),          # lane-dense output
        compiler_params=pltpu.CompilerParams(
            dimension_semantics=("parallel",),
            vmem_limit_bytes=48 * 1024 * 1024,                      # < v7x 64 MiB phys
        ),
    )(xut_aug, w1_aug, w2_row, b2_smem)

    return out[0, :B][:, None]                                      # (B, 1)


def init_params(key):
    """Deterministic init matching nn.Linear(6,128) and nn.Linear(128,1)."""
    k1, k2, k3, k4 = jax.random.split(key, 4)
    lim1 = 1.0 / jnp.sqrt(6.0)
    lim2 = 1.0 / jnp.sqrt(128.0)
    w1 = jax.random.uniform(k1, (HIDDEN, IN_DIM), jnp.float32, -lim1, lim1)
    b1 = jax.random.uniform(k2, (HIDDEN,), jnp.float32, -lim1, lim1)
    w2 = jax.random.uniform(k3, (OUT_DIM, HIDDEN), jnp.float32, -lim2, lim2)
    b2 = jax.random.uniform(k4, (1, 1), jnp.float32, -lim2, lim2)
    return w1, b1, w2, b2


def reference_forward(x, u, w1, b1, w2, b2):
    # Plain f32 reference (the kernel keeps all operands in f32).
    xu = jnp.concatenate([x, u], axis=-1)
    h = jnp.maximum(
        jnp.dot(xu, w1.T, precision=jax.lax.Precision.HIGHEST) + b1, 0.0)
    v = jnp.dot(h, w2.T, precision=jax.lax.Precision.HIGHEST) + b2
    return v                                                        # (B, 1)


if __name__ == "__main__":
    key = jax.random.PRNGKey(0)
    kx, ku, kp, kx2, ku2 = jax.random.split(key, 5)
    w1, b1, w2, b2 = init_params(kp)

    # Small test batch.
    B = 8
    x = jax.random.normal(kx, (B, 4), jnp.float32)    # state dim 4
    u = jax.random.normal(ku, (B, 2), jnp.float32)    # action dim 2 (4+2=6)

    out = qcritic_forward(x, u, w1, b1, w2, b2)
    out = jax.block_until_ready(out)
    ref = reference_forward(x, u, w1, b1, w2, b2)
    assert out.shape == (B, 1)
    assert jnp.allclose(out, ref, atol=2e-3, rtol=2e-3), "mismatch vs reference (B=8)"

    # Second case exercising a multi-block (2-step) batch grid.
    B2 = 1100
    x2 = jax.random.normal(kx2, (B2, 4), jnp.float32)
    u2 = jax.random.normal(ku2, (B2, 2), jnp.float32)
    out2 = jax.block_until_ready(qcritic_forward(x2, u2, w1, b1, w2, b2))
    ref2 = reference_forward(x2, u2, w1, b1, w2, b2)
    assert out2.shape == (B2, 1)
    assert jnp.allclose(out2, ref2, atol=2e-3, rtol=2e-3), "mismatch vs reference (B=1100)"

    print("KERNEL_OK")
</pallas_src>

<mosaic_0001>
module attributes {stable_mosaic.version = 11 : i64} {
  func.func @qcritic_kernel(%arg0: i32, %arg1: memref<8x512xf32, #tpu.memory_space<vmem>>, %arg2: memref<128x8xf32, #tpu.memory_space<vmem>>, %arg3: memref<1x128xf32, #tpu.memory_space<vmem>>, %arg4: memref<1x1xf32, #tpu.memory_space<smem>>, %arg5: memref<1x512xf32, #tpu.memory_space<vmem>>) attributes {dimension_semantics = [#tpu.dimension_semantics<parallel>], iteration_bounds = array<i64: 1>, scalar_prefetch = 0 : i64, scratch_operands = 0 : i64, tpu.core_type = #tpu.core_type<tc>, window_params = [{transform_indices = @transform_0, window_bounds = array<i64: 8, 512>}, {pipeline_mode = #tpu.pipeline_mode<synchronous>, transform_indices = @transform_1, window_bounds = array<i64: 128, 8>}, {pipeline_mode = #tpu.pipeline_mode<synchronous>, transform_indices = @transform_2, window_bounds = array<i64: 1, 128>}, {transform_indices = @transform_3, window_bounds = array<i64: 1, 1>}, {transform_indices = @transform_4, window_bounds = array<i64: 1, 512>}]} {
    %c0 = arith.constant 0 : index
    %c0_0 = arith.constant 0 : index
    %0 = vector.load %arg2[%c0, %c0_0] : memref<128x8xf32, #tpu.memory_space<vmem>>, vector<128x8xf32>
    %c0_1 = arith.constant 0 : index
    %c0_2 = arith.constant 0 : index
    %1 = vector.load %arg1[%c0_1, %c0_2] : memref<8x512xf32, #tpu.memory_space<vmem>>, vector<8x512xf32>
    %cst = arith.constant dense<0.000000e+00> : vector<128x512xf32>
    %2 = tpu.matmul %0, %1, %cst {dimension_numbers = #tpu.dot_dimension_numbers<[1], [0], [0], [1], [0, 0, 1, 1], [], []>} : vector<128x8xf32>, vector<8x512xf32>, vector<128x512xf32> -> vector<128x512xf32>
    %cst_3 = arith.constant 0.000000e+00 : f32
    %3 = vector.broadcast %cst_3 : f32 to vector<128x512xf32>
    %4 = arith.maximumf %2, %3 : vector<128x512xf32>
    %c0_4 = arith.constant 0 : index
    %c0_5 = arith.constant 0 : index
    %5 = vector.load %arg3[%c0_4, %c0_5] : memref<1x128xf32, #tpu.memory_space<vmem>>, vector<1x128xf32>
    %cst_6 = arith.constant dense<0.000000e+00> : vector<1x512xf32>
    %6 = tpu.matmul %5, %4, %cst_6 {dimension_numbers = #tpu.dot_dimension_numbers<[1], [0], [0], [1], [0, 0, 1, 1], [], []>} : vector<1x128xf32>, vector<128x512xf32>, vector<1x512xf32> -> vector<1x512xf32>
    %c0_7 = arith.constant 0 : index
    %c0_8 = arith.constant 0 : index
    %7 = memref.load %arg4[%c0_7, %c0_8] : memref<1x1xf32, #tpu.memory_space<smem>>
    %8 = vector.broadcast %7 : f32 to vector<1x512xf32>
    %9 = arith.addf %6, %8 : vector<1x512xf32>
    %c0_9 = arith.constant 0 : index
    %c0_10 = arith.constant 0 : index
    %10 = vector.load %arg5[%c0_9, %c0_10] : memref<1x512xf32, #tpu.memory_space<vmem>>, vector<1x512xf32>
    tpu.vector_store %arg5[%c0_9, %c0_10], %9 {strides = array<i32>} : memref<1x512xf32, #tpu.memory_space<vmem>>, vector<1x512xf32>,
    return
  }
  func.func @transform_0(%arg0: i32) -> (i32, i32) {
    %c0_i32 = arith.constant 0 : i32
    %c0_i32_0 = arith.constant 0 : i32
    return %c0_i32, %arg0 : i32, i32
  }
  func.func @transform_1(%arg0: i32) -> (i32, i32) {
    %c0_i32 = arith.constant 0 : i32
    %c0_i32_0 = arith.constant 0 : i32
    %c0_i32_1 = arith.constant 0 : i32
    return %c0_i32, %c0_i32_0 : i32, i32
  }
  func.func @transform_2(%arg0: i32) -> (i32, i32) {
    %c0_i32 = arith.constant 0 : i32
    %c0_i32_0 = arith.constant 0 : i32
    %c0_i32_1 = arith.constant 0 : i32
    return %c0_i32, %c0_i32_0 : i32, i32
  }
  func.func @transform_3(%arg0: i32) -> (i32, i32) {
    %c0_i32 = arith.constant 0 : i32
    %c0_i32_0 = arith.constant 0 : i32
    %c0_i32_1 = arith.constant 0 : i32
    return %c0_i32, %c0_i32_0 : i32, i32
  }
  func.func @transform_4(%arg0: i32) -> (i32, i32) {
    %c0_i32 = arith.constant 0 : i32
    %c0_i32_0 = arith.constant 0 : i32
    return %c0_i32, %arg0 : i32, i32
  }
}

</mosaic_0001>

<bundles_post_ra>
// kernel: tpu_custom_call.1
= control target key start
LH: loop header
LB: loop body
LE: loop exit
PB: predicated region body
PF: predicated region fallthrough
CT: control target
= control target key end

     0   :  { %vm39_vm0 = vcmask 64512   ;;  %v790_v5 = vmov 0.0   ;;  %s962_s0 = inlined_call_operand.vmem [shape: f32[8,512], index: 0, kind: input, shape index: {}]   ;;  %s963_s1 = inlined_call_operand.vmem [shape: f32[128,8], index: 1, kind: input, shape index: {}]   ;;  %s964_s2 = inlined_call_operand.vmem [shape: f32[1,128], index: 2, kind: input, shape index: {}]   ;;  %s965_s3 = inlined_call_operand.<no memory space> [shape: f32[1,1], index: 3, kind: input, shape index: {}]   ;;  %s966_s4 = inlined_call_operand.hbm [shape: f32[1,512], index: 4, kind: output, shape index: {}]  }
   0x1   :  { %v36_v0 = vld [vmem:[%s962_s0 + $0x8] sm:$0xff]  ;;  %v38_v1 = vld [vmem:[%s962_s0 + $0x18] sm:$0xff]  ;;  %v35_v2 = vld [vmem:[%s962_s0] sm:$0xff]  ;;  %152 = vmatprep.mubr.f32.mxu0 %v790_v5  ;;  %313 = vmatprep.mubr.f32.mxu1 %v790_v5 }
   0x2   :  { %88 = vmatprep.subr.mxu0 %v36_v0  ;;  %249 = vmatprep.subr.mxu1 %v38_v1  ;;  %v37_v3 = vld [vmem:[%s962_s0 + $0x10] sm:$0xff]  ;;  %v19_v4 = vld [vmem:[%s963_s1] sm:$0xff]  ;;  %v20_v6 = vld [vmem:[%s963_s1 + $0x8] sm:$0xff] }
   0x3   :  { %89 = vmatpush1.msra.mxu0 %v35_v2  ;;  %250 = vmatpush1.msra.mxu1 %v37_v3 }
   0x4   :  { %667 = vmatmul.mubr.msk.f32.vlgmr.msra.gmra.mrb[0].mxu0 %vm39_vm0, %v19_v4  ;;  %683 = vmatmul.mubr.msk.f32.vlgmr.msra.gmra.mrb[0].mxu1 %vm39_vm0, %v19_v4 }
   0x5   :  { %158 = vmatprep.mubr.f32.mxu0 %v790_v5  ;;  %319 = vmatprep.mubr.f32.mxu1 %v790_v5 }
   0x6   :  { %10 = vsyncpa [#allocation4], 0  ;;  %v21_v7 = vld [vmem:[%s963_s1 + $0x10] sm:$0xff]  ;;  %v22_v8 = vld [vmem:[%s963_s1 + $0x18] sm:$0xff] }
   0x7   :  { %v23_v9 = vld [vmem:[%s963_s1 + $0x20] sm:$0xff]  ;;  %v24_v10 = vld [vmem:[%s963_s1 + $0x28] sm:$0xff]  ;;  %v25_v11 = vld [vmem:[%s963_s1 + $0x30] sm:$0xff] }
   0x8   :  { %668 = vmatmul.mubr.msk.f32.gmra.mrb[2].mxu0 %vm39_vm0, %v20_v6  ;;  %684 = vmatmul.mubr.msk.f32.gmra.mrb[2].mxu1 %vm39_vm0, %v20_v6  ;;  %v26_v12 = vld [vmem:[%s963_s1 + $0x38] sm:$0xff]  ;;  %v27_v13 = vld [vmem:[%s963_s1 + $0x40] sm:$0xff]  ;;  %v28_v14 = vld [vmem:[%s963_s1 + $0x48] sm:$0xff] }
   0x9   :  { %164 = vmatprep.mubr.f32.mxu0 %v790_v5  ;;  %325 = vmatprep.mubr.f32.mxu1 %v790_v5  ;;  %v29_v15 = vld [vmem:[%s963_s1 + $0x50] sm:$0xff]  ;;  %v30_v16 = vld [vmem:[%s963_s1 + $0x58] sm:$0xff]  ;;  %v31_v17 = vld [vmem:[%s963_s1 + $0x60] sm:$0xff] }
   0xa   :  { %v32_v18 = vld [vmem:[%s963_s1 + $0x68] sm:$0xff]  ;;  %v33_v19 = vld [vmem:[%s963_s1 + $0x70] sm:$0xff]  ;;  %v34_v20 = vld [vmem:[%s963_s1 + $0x78] sm:$0xff] }
   0xc   :  { %669 = vmatmul.mubr.msk.f32.gmra.mrb[4].mxu0 %vm39_vm0, %v21_v7  ;;  %685 = vmatmul.mubr.msk.f32.gmra.mrb[4].mxu1 %vm39_vm0, %v21_v7 }
   0xd   :  { %170 = vmatprep.mubr.f32.mxu0 %v790_v5  ;;  %331 = vmatprep.mubr.f32.mxu1 %v790_v5 }
  0x10   :  { %670 = vmatmul.mubr.msk.f32.gmra.mrb[6].mxu0 %vm39_vm0, %v22_v8  ;;  %686 = vmatmul.mubr.msk.f32.gmra.mrb[6].mxu1 %vm39_vm0, %v22_v8 }
  0x11   :  { %176 = vmatprep.mubr.f32.mxu0 %v790_v5  ;;  %337 = vmatprep.mubr.f32.mxu1 %v790_v5 }
  0x14   :  { %671 = vmatmul.mubr.msk.f32.gmra.mrb[8].mxu0 %vm39_vm0, %v23_v9  ;;  %687 = vmatmul.mubr.msk.f32.gmra.mrb[8].mxu1 %vm39_vm0, %v23_v9 }
  0x15   :  { %182 = vmatprep.mubr.f32.mxu0 %v790_v5  ;;  %343 = vmatprep.mubr.f32.mxu1 %v790_v5 }
  0x18   :  { %672 = vmatmul.mubr.msk.f32.gmra.mrb[10].mxu0 %vm39_vm0, %v24_v10  ;;  %688 = vmatmul.mubr.msk.f32.gmra.mrb[10].mxu1 %vm39_vm0, %v24_v10 }
  0x19   :  { %188 = vmatprep.mubr.f32.mxu0 %v790_v5  ;;  %349 = vmatprep.mubr.f32.mxu1 %v790_v5 }
  0x1c   :  { %673 = vmatmul.mubr.msk.f32.gmra.mrb[12].mxu0 %vm39_vm0, %v25_v11  ;;  %689 = vmatmul.mubr.msk.f32.gmra.mrb[12].mxu1 %vm39_vm0, %v25_v11 }
  0x1d   :  { %194 = vmatprep.mubr.f32.mxu0 %v790_v5  ;;  %355 = vmatprep.mubr.f32.mxu1 %v790_v5 }
  0x20   :  { %674 = vmatmul.mubr.msk.f32.gmra.mrb[14].mxu0 %vm39_vm0, %v26_v12  ;;  %690 = vmatmul.mubr.msk.f32.gmra.mrb[14].mxu1 %vm39_vm0, %v26_v12 }
  0x21   :  { %200 = vmatprep.mubr.f32.mxu0 %v790_v5  ;;  %361 = vmatprep.mubr.f32.mxu1 %v790_v5 }
  0x24   :  { %675 = vmatmul.mubr.msk.f32.gmra.mrb[16].mxu0 %vm39_vm0, %v27_v13  ;;  %691 = vmatmul.mubr.msk.f32.gmra.mrb[16].mxu1 %vm39_vm0, %v27_v13 }
  0x25   :  { %206 = vmatprep.mubr.f32.mxu0 %v790_v5  ;;  %367 = vmatprep.mubr.f32.mxu1 %v790_v5 }
  0x28   :  { %676 = vmatmul.mubr.msk.f32.gmra.mrb[18].mxu0 %vm39_vm0, %v28_v14  ;;  %692 = vmatmul.mubr.msk.f32.gmra.mrb[18].mxu1 %vm39_vm0, %v28_v14 }
  0x29   :  { %212 = vmatprep.mubr.f32.mxu0 %v790_v5  ;;  %373 = vmatprep.mubr.f32.mxu1 %v790_v5 }
  0x2c   :  { %677 = vmatmul.mubr.msk.f32.gmra.mrb[20].mxu0 %vm39_vm0, %v29_v15  ;;  %693 = vmatmul.mubr.msk.f32.gmra.mrb[20].mxu1 %vm39_vm0, %v29_v15 }
  0x2d   :  { %218 = vmatprep.mubr.f32.mxu0 %v790_v5  ;;  %379 = vmatprep.mubr.f32.mxu1 %v790_v5 }
  0x30   :  { %678 = vmatmul.mubr.msk.f32.gmra.mrb[22].mxu0 %vm39_vm0, %v30_v16  ;;  %694 = vmatmul.mubr.msk.f32.gmra.mrb[22].mxu1 %vm39_vm0, %v30_v16 }
  0x31   :  { %224 = vmatprep.mubr.f32.mxu0 %v790_v5  ;;  %385 = vmatprep.mubr.f32.mxu1 %v790_v5 }
  0x34   :  { %679 = vmatmul.mubr.msk.f32.gmra.mrb[24].mxu0 %vm39_vm0, %v31_v17  ;;  %695 = vmatmul.mubr.msk.f32.gmra.mrb[24].mxu1 %vm39_vm0, %v31_v17 }
  0x35   :  { %230 = vmatprep.mubr.f32.mxu0 %v790_v5  ;;  %391 = vmatprep.mubr.f32.mxu1 %v790_v5 }
  0x38   :  { %680 = vmatmul.mubr.msk.f32.gmra.mrb[26].mxu0 %vm39_vm0, %v32_v18  ;;  %696 = vmatmul.mubr.msk.f32.gmra.mrb[26].mxu1 %vm39_vm0, %v32_v18 }
  0x39   :  { %236 = vmatprep.mubr.f32.mxu0 %v790_v5  ;;  %397 = vmatprep.mubr.f32.mxu1 %v790_v5 }
  0x3c   :  { %681 = vmatmul.mubr.msk.f32.gmra.mrb[28].mxu0 %vm39_vm0, %v33_v19  ;;  %697 = vmatmul.mubr.msk.f32.gmra.mrb[28].mxu1 %vm39_vm0, %v33_v19 }
  0x3d   :  { %242 = vmatprep.mubr.f32.mxu0 %v790_v5  ;;  %403 = vmatprep.mubr.f32.mxu1 %v790_v5 }
  0x40   :  { %682 = vmatmul.mubr.msk.f32.gmra.mrb[30].mxu0 %vm39_vm0, %v34_v20  ;;  %698 = vmatmul.mubr.msk.f32.gmra.mrb[30].mxu1 %vm39_vm0, %v34_v20 }
  0x41   :  { %541 = vmatprep.mubr.f32.mxu0 %v790_v5  ;;  %612 = vmatprep.mubr.f32.mxu1 %v790_v5 }
  0xd7   :  { %v154_v21 = vpop.f32.mrb[0].mxu0  ;;  %v315_v22 = vpop.f32.mrb[0].mxu1 }
  0xd8   :  { %v156_v23 = vpop.f32.mrb[1].mxu0  ;;  %v317_v24 = vpop.f32.mrb[1].mxu1  ;;  %v410_v27 = vmax.f32 %v154_v21, 0.0  ;;  %v412_v28 = vmax.f32 %v315_v22, 0.0 }
  0xd9   :  { %v411_v33 = vmax.f32 %v156_v23, 0.0  ;;  %v413_v34 = vmax.f32 %v317_v24, 0.0 }
  0xdb   :  { %v160_v25 = vpop.f32.mrb[2].mxu0  ;;  %v321_v26 = vpop.f32.mrb[2].mxu1 }
  0xdc   :  { %v414_v29 = vmax.f32 %v160_v25, 0.0  ;;  %v416_v30 = vmax.f32 %v321_v26, 0.0  ;;  %v162_v31 = vpop.f32.mrb[3].mxu0  ;;  %v323_v32 = vpop.f32.mrb[3].mxu1 }
  0xdd   :  { %v415_v35 = vmax.f32 %v162_v31, 0.0  ;;  %v417_v36 = vmax.f32 %v323_v32, 0.0 }
  0xde   :  { %v701_v37 = vpack.c.bf16 %v414_v29, %v410_v27  ;;  %v733_v38 = vpack.c.bf16 %v416_v30, %v412_v28 }
  0xdf   :  { %v699_v39 = vpack.c.bf16 %v415_v35, %v411_v33  ;;  %v731_v40 = vpack.c.bf16 %v417_v36, %v413_v34  ;;  %v166_v41 = vpop.f32.mrb[4].mxu0  ;;  %v327_v42 = vpop.f32.mrb[4].mxu1 }
  0xe0   :  { %v168_v43 = vpop.f32.mrb[5].mxu0  ;;  %v329_v44 = vpop.f32.mrb[5].mxu1  ;;  %v418_v47 = vmax.f32 %v166_v41, 0.0  ;;  %v420_v48 = vmax.f32 %v327_v42, 0.0 }
  0xe1   :  { %700 = vmatprep.subr.bf16.mxu0 %v699_v39  ;;  %732 = vmatprep.subr.bf16.mxu1 %v731_v40  ;;  %v419_v53 = vmax.f32 %v168_v43, 0.0  ;;  %v421_v54 = vmax.f32 %v329_v44, 0.0 }
  0xe2   :  { %702 = vmatpush1.bf16.msra.mxu0 %v701_v37  ;;  %734 = vmatpush1.bf16.msra.mxu1 %v733_v38 }
  0xe3   :  { %v172_v45 = vpop.f32.mrb[6].mxu0  ;;  %v333_v46 = vpop.f32.mrb[6].mxu1 }
  0xe4   :  { %v422_v49 = vmax.f32 %v172_v45, 0.0  ;;  %v424_v50 = vmax.f32 %v333_v46, 0.0  ;;  %v174_v51 = vpop.f32.mrb[7].mxu0  ;;  %v335_v52 = vpop.f32.mrb[7].mxu1 }
  0xe5   :  { %v423_v55 = vmax.f32 %v174_v51, 0.0  ;;  %v425_v56 = vmax.f32 %v335_v52, 0.0 }
  0xe6   :  { %v705_v57 = vpack.c.bf16 %v422_v49, %v418_v47  ;;  %v737_v58 = vpack.c.bf16 %v424_v50, %v420_v48 }
  0xe7   :  { %v703_v59 = vpack.c.bf16 %v423_v55, %v419_v53  ;;  %v735_v60 = vpack.c.bf16 %v425_v56, %v421_v54  ;;  %v178_v61 = vpop.f32.mrb[8].mxu0  ;;  %v339_v62 = vpop.f32.mrb[8].mxu1 }
  0xe8   :  { %v180_v63 = vpop.f32.mrb[9].mxu0  ;;  %v341_v0 = vpop.f32.mrb[9].mxu1  ;;  %v426_v3 = vmax.f32 %v178_v61, 0.0  ;;  %v428_v4 = vmax.f32 %v339_v62, 0.0 }
  0xe9   :  { %704 = vmatprep.subr.bf16.mxu0 %v703_v59  ;;  %736 = vmatprep.subr.bf16.mxu1 %v735_v60  ;;  %v427_v9 = vmax.f32 %v180_v63, 0.0  ;;  %v429_v10 = vmax.f32 %v341_v0, 0.0 }
  0xea   :  { %706 = vmatpush1.bf16.msra.mxu0 %v705_v57  ;;  %738 = vmatpush1.bf16.msra.mxu1 %v737_v58 }
  0xeb   :  { %v184_v1 = vpop.f32.mrb[10].mxu0  ;;  %v345_v2 = vpop.f32.mrb[10].mxu1 }
  0xec   :  { %v430_v5 = vmax.f32 %v184_v1, 0.0  ;;  %v432_v6 = vmax.f32 %v345_v2, 0.0  ;;  %v186_v7 = vpop.f32.mrb[11].mxu0  ;;  %v347_v8 = vpop.f32.mrb[11].mxu1 }
  0xed   :  { %v431_v11 = vmax.f32 %v186_v7, 0.0  ;;  %v433_v12 = vmax.f32 %v347_v8, 0.0 }
  0xee   :  { %v709_v13 = vpack.c.bf16 %v430_v5, %v426_v3  ;;  %v741_v14 = vpack.c.bf16 %v432_v6, %v428_v4 }
  0xef   :  { %v707_v15 = vpack.c.bf16 %v431_v11, %v427_v9  ;;  %v739_v16 = vpack.c.bf16 %v433_v12, %v429_v10  ;;  %v190_v17 = vpop.f32.mrb[12].mxu0  ;;  %v351_v18 = vpop.f32.mrb[12].mxu1 }
  0xf0   :  { %v192_v19 = vpop.f32.mrb[13].mxu0  ;;  %v353_v20 = vpop.f32.mrb[13].mxu1  ;;  %v434_v23 = vmax.f32 %v190_v17, 0.0  ;;  %v436_v24 = vmax.f32 %v351_v18, 0.0 }
  0xf1   :  { %708 = vmatprep.subr.bf16.mxu0 %v707_v15  ;;  %740 = vmatprep.subr.bf16.mxu1 %v739_v16  ;;  %v435_v29 = vmax.f32 %v192_v19, 0.0  ;;  %v437_v30 = vmax.f32 %v353_v20, 0.0 }
  0xf2   :  { %710 = vmatpush1.bf16.msra.mxu0 %v709_v13  ;;  %742 = vmatpush1.bf16.msra.mxu1 %v741_v14 }
  0xf3   :  { %v196_v21 = vpop.f32.mrb[14].mxu0  ;;  %v357_v22 = vpop.f32.mrb[14].mxu1 }
  0xf4   :  { %v438_v25 = vmax.f32 %v196_v21, 0.0  ;;  %v440_v26 = vmax.f32 %v357_v22, 0.0  ;;  %v198_v27 = vpop.f32.mrb[15].mxu0  ;;  %v359_v28 = vpop.f32.mrb[15].mxu1 }
  0xf5   :  { %v439_v31 = vmax.f32 %v198_v27, 0.0  ;;  %v441_v32 = vmax.f32 %v359_v28, 0.0 }
  0xf6   :  { %v713_v33 = vpack.c.bf16 %v438_v25, %v434_v23  ;;  %v745_v34 = vpack.c.bf16 %v440_v26, %v436_v24 }
  0xf7   :  { %v711_v35 = vpack.c.bf16 %v439_v31, %v435_v29  ;;  %v743_v36 = vpack.c.bf16 %v441_v32, %v437_v30  ;;  %v202_v37 = vpop.f32.mrb[16].mxu0  ;;  %v363_v38 = vpop.f32.mrb[16].mxu1 }
  0xf8   :  { %v204_v39 = vpop.f32.mrb[17].mxu0  ;;  %v365_v40 = vpop.f32.mrb[17].mxu1  ;;  %v442_v43 = vmax.f32 %v202_v37, 0.0  ;;  %v444_v44 = vmax.f32 %v363_v38, 0.0 }
  0xf9   :  { %712 = vmatprep.subr.bf16.mxu0 %v711_v35  ;;  %744 = vmatprep.subr.bf16.mxu1 %v743_v36  ;;  %v443_v49 = vmax.f32 %v204_v39, 0.0  ;;  %v445_v50 = vmax.f32 %v365_v40, 0.0 }
  0xfa   :  { %714 = vmatpush1.bf16.msra.mxu0 %v713_v33  ;;  %746 = vmatpush1.bf16.msra.mxu1 %v745_v34 }
  0xfb   :  { %v208_v41 = vpop.f32.mrb[18].mxu0  ;;  %v369_v42 = vpop.f32.mrb[18].mxu1 }
  0xfc   :  { %v446_v45 = vmax.f32 %v208_v41, 0.0  ;;  %v448_v46 = vmax.f32 %v369_v42, 0.0  ;;  %v210_v47 = vpop.f32.mrb[19].mxu0  ;;  %v371_v48 = vpop.f32.mrb[19].mxu1 }
  0xfd   :  { %v447_v51 = vmax.f32 %v210_v47, 0.0  ;;  %v449_v52 = vmax.f32 %v371_v48, 0.0 }
  0xfe   :  { %v717_v53 = vpack.c.bf16 %v446_v45, %v442_v43  ;;  %v749_v54 = vpack.c.bf16 %v448_v46, %v444_v44 }
  0xff   :  { %v715_v55 = vpack.c.bf16 %v447_v51, %v443_v49  ;;  %v747_v56 = vpack.c.bf16 %v449_v52, %v445_v50  ;;  %v214_v57 = vpop.f32.mrb[20].mxu0  ;;  %v375_v58 = vpop.f32.mrb[20].mxu1 }
 0x100   :  { %v216_v59 = vpop.f32.mrb[21].mxu0  ;;  %v377_v60 = vpop.f32.mrb[21].mxu1  ;;  %v450_v63 = vmax.f32 %v214_v57, 0.0  ;;  %v452_v0 = vmax.f32 %v375_v58, 0.0  ;;  %v476_v57 = vstv %s965_s3 }
 0x101   :  { %716 = vmatprep.subr.bf16.mxu0 %v715_v55  ;;  %748 = vmatprep.subr.bf16.mxu1 %v747_v56  ;;  %v451_v5 = vmax.f32 %v216_v59, 0.0  ;;  %v453_v6 = vmax.f32 %v377_v60, 0.0  ;;  %v628_v56 = vlaneseq }
 0x102   :  { %718 = vmatpush1.bf16.msra.mxu0 %v717_v53  ;;  %750 = vmatpush1.bf16.msra.mxu1 %v749_v54  ;;  %v474_v53 = vld [vmem:[%s964_s2] sm:$0x1]  ;;  %v791_v54 = vmov 1966171168   ;;  %s792_s2 = smov [#allocation3]  }
 0x103   :  { %v220_v61 = vpop.f32.mrb[22].mxu0  ;;  %v381_v62 = vpop.f32.mrb[22].mxu1  ;;  %v626_v55 = vunpack.c.l.s4 %v791_v54  ;;  %v629_v59 = vshrl.u32 %v628_v56, 7  ;;  %s659_s30 = sshll.u32 %s792_s2, 4  ;;  %vm650_vm1 = vcmp.lt.s32.totalorder %v628_v56, 512  ;;  %s660_s30 = int_to_ptr.vmem [resolvable:$true] %s659_s30 }
 0x104   :  { %v454_v1 = vmax.f32 %v220_v61, 0.0  ;;  %v456_v2 = vmax.f32 %v381_v62, 0.0  ;;  %v222_v3 = vpop.f32.mrb[23].mxu0  ;;  %v383_v4 = vpop.f32.mrb[23].mxu1  ;;  %s766_s3 = scalar_lea.vmem %s660_s30, 64  ;;  %p771_p1 = scmp.lt.s32.totalorder %s660_s30, %s660_s30 }
 0x105   :  { %v455_v7 = vmax.f32 %v222_v3, 0.0  ;;  %v457_v8 = vmax.f32 %v383_v4, 0.0  ;;  %v627_v58 = vunpack.c.0.s8 %v626_v55  ;;  %p767_p0 = scmp.ne.s32.totalorder %s660_s30, %s766_s3  ;;  %p772_p2 = scmp.lt.s32.totalorder %s766_s3, %s766_s3 }
 0x106   :  { %v721_v9 = vpack.c.bf16 %v454_v1, %v450_v63  ;;  %v753_v10 = vpack.c.bf16 %v456_v2, %v452_v0 }
 0x107   :  { %v719_v11 = vpack.c.bf16 %v455_v7, %v451_v5  ;;  %v751_v12 = vpack.c.bf16 %v457_v8, %v453_v6  ;;  %v226_v13 = vpop.f32.mrb[24].mxu0  ;;  %v387_v14 = vpop.f32.mrb[24].mxu1  ;;  %v630_v3 = vsub.s32 %v627_v58, %v629_v59  ;;  %p773_p3 = por %p772_p2, %p771_p1 }
 0x108   :  { %v228_v15 = vpop.f32.mrb[25].mxu0  ;;  %v389_v16 = vpop.f32.mrb[25].mxu1  ;;  %v458_v19 = vmax.f32 %v226_v13, 0.0  ;;  %v460_v20 = vmax.f32 %v387_v14, 0.0 }
 0x109   :  { %720 = vmatprep.subr.bf16.mxu0 %v719_v11  ;;  %752 = vmatprep.subr.bf16.mxu1 %v751_v12  ;;  %v459_v25 = vmax.f32 %v228_v15, 0.0  ;;  %v461_v26 = vmax.f32 %v389_v16, 0.0  ;;  %p774_p4 = pnand %p773_p3, %p767_p0 }
 0x10a   :  { %722 = vmatpush1.bf16.msra.mxu0 %v721_v9  ;;  %754 = vmatpush1.bf16.msra.mxu1 %v753_v10 }
 0x10b   :  { %v232_v17 = vpop.f32.mrb[26].mxu0  ;;  %v393_v18 = vpop.f32.mrb[26].mxu1 }
 0x10c   :  { %v462_v21 = vmax.f32 %v232_v17, 0.0  ;;  %v464_v22 = vmax.f32 %v393_v18, 0.0  ;;  %v234_v23 = vpop.f32.mrb[27].mxu0  ;;  %v395_v24 = vpop.f32.mrb[27].mxu1 }
 0x10d   :  { %v463_v27 = vmax.f32 %v234_v23, 0.0  ;;  %v465_v28 = vmax.f32 %v395_v24, 0.0 }
 0x10e   :  { %v725_v29 = vpack.c.bf16 %v462_v21, %v458_v19  ;;  %v757_v30 = vpack.c.bf16 %v464_v22, %v460_v20 }
 0x10f   :  { %v723_v31 = vpack.c.bf16 %v463_v27, %v459_v25  ;;  %v755_v32 = vpack.c.bf16 %v465_v28, %v461_v26  ;;  %v238_v33 = vpop.f32.mrb[28].mxu0  ;;  %v399_v34 = vpop.f32.mrb[28].mxu1 }
 0x110   :  { %v240_v35 = vpop.f32.mrb[29].mxu0  ;;  %v401_v36 = vpop.f32.mrb[29].mxu1  ;;  %v466_v39 = vmax.f32 %v238_v33, 0.0  ;;  %v468_v40 = vmax.f32 %v399_v34, 0.0 }
 0x111   :  { %724 = vmatprep.subr.bf16.mxu0 %v723_v31  ;;  %756 = vmatprep.subr.bf16.mxu1 %v755_v32  ;;  %v467_v45 = vmax.f32 %v240_v35, 0.0  ;;  %v469_v46 = vmax.f32 %v401_v36, 0.0 }
 0x112   :  { %726 = vmatpush1.bf16.msra.mxu0 %v725_v29  ;;  %758 = vmatpush1.bf16.msra.mxu1 %v757_v30 }
 0x113   :  { %v244_v37 = vpop.f32.mrb[30].mxu0  ;;  %v405_v38 = vpop.f32.mrb[30].mxu1 }
 0x114   :  { %v470_v41 = vmax.f32 %v244_v37, 0.0  ;;  %v472_v42 = vmax.f32 %v405_v38, 0.0  ;;  %v246_v43 = vpop.f32.mrb[31].mxu0  ;;  %v407_v44 = vpop.f32.mrb[31].mxu1 }
 0x115   :  { %v471_v47 = vmax.f32 %v246_v43, 0.0  ;;  %v473_v48 = vmax.f32 %v407_v44, 0.0 }
 0x116   :  { %v729_v49 = vpack.c.bf16 %v470_v41, %v466_v39  ;;  %v761_v50 = vpack.c.bf16 %v472_v42, %v468_v40 }
 0x117   :  { %v727_v51 = vpack.c.bf16 %v471_v47, %v467_v45  ;;  %v759_v52 = vpack.c.bf16 %v473_v48, %v469_v46 }
 0x119   :  { %728 = vmatprep.subr.bf16.mxu0 %v727_v51  ;;  %760 = vmatprep.subr.bf16.mxu1 %v759_v52 }
 0x11a   :  { %730 = vmatpush1.bf16.msra.mxu0 %v729_v49  ;;  %762 = vmatpush1.bf16.msra.mxu1 %v761_v50 }
 0x11d   :  { %542 = vmatmul.mubr.f32.vlgmr.msra.gmra.mrb[32].mxu0 %v474_v53  ;;  %613 = vmatmul.mubr.f32.vlgmr.msra.gmra.mrb[32].mxu1 %v474_v53 }
 0x1f0   :  { %v543_v60 = vpop.f32.mrb[32].mxu0  ;;  %v614_v61 = vpop.f32.mrb[32].mxu1 }
 0x1f1   :  { %v544_v62 = vadd.f32 %v543_v60, %v476_v57  ;;  %v615_v63 = vadd.f32 %v614_v61, %v476_v57  ;;  %v545_v0 = vpop.f32.mrb[33].mxu0  ;;  %v616_v1 = vpop.f32.mrb[33].mxu1 }
 0x1f2   :  { %v546_v2 = vadd.f32 %v545_v0, %v476_v57  ;;  %v617_v4 = vadd.f32 %v616_v1, %v476_v57 }
 0x1f4   :  { %v623_v5 = vcombine.low %v544_v62, %v546_v2  ;;  %v624_v6 = vcombine.low %v615_v63, %v617_v4 }
 0x1f6   :  { %v631_v7 = vrot.slane %v623_v5, %v630_v3  ;;  %v638_v8 = vrot.slane %v624_v6, %v630_v3 }
 0x1f8   :  { %v639_v9 = vcombine.low %v631_v7, %v638_v8 }
 0x1fa   :  { %v646_v10 = vrot.slane %v639_v9, %v630_v3 }
 0x1fc   :  { %652 = vst.msk [vmem:[#allocation3] sm:$0xf] %vm650_vm1, %v646_v10 }
 0x1fd   :  { %777 = shalt.err (!%p774_p4)
}
 0x1fe   :  { %s778_s7 = scalar_lea.hbm %s966_s4, 64 }
 0x1ff   :  { %p779_p5 = scmp.ne.s32.totalorder %s966_s4, %s778_s7  ;;  %p782_p6 = scmp.lt.u32.totalorder %s778_s7, %s966_s4 }
 0x201   :  { %p784_p7 = pnand %p782_p6, %p779_p5 }
 0x203   :  { %787 = shalt.err (!%p784_p7)
}
 0x204   :  { %662 = dma.vmem_to_hbm [thread:$0]  %s660_s30, 64, %s966_s4, [#allocation4]  }
 0x205   :  { %788 = dma.done.wait [#allocation4], 64  }
 0x206   :  { %789 = vsyncadd [#allocation4], 4294967232 }
 0x207   :  { %666 = vsyncpa [#allocation4], 1 }

</bundles_post_ra>
